<compile_context>
chip_gen: v7x
topology: tpu7x:2x2x1
jax: 0.10.0
libtpu: 0.0.40
codegen_flags: <defaults>
</compile_context>

<pallas_src>
import functools

import jax
import jax.numpy as jnp
from jax.experimental import pallas as pl
from jax.experimental.pallas import tpu as pltpu

LANE = 128          # vreg lane width (last dim)
BF16_SUBLANE = 16   # bf16 packs 16 rows per vreg


def _round_up(n, m):
    return pl.cdiv(n, m) * m


def dqn_kernel(x_ref, w1_ref, b1_ref, w2_ref, b2_ref, w3_ref, b3_ref, o_ref):
    """Fused fc1->relu->fc2->relu->fc3 for one batch tile.

    x arrives as f32 (unpadded feature dim) and is cast to bf16 in-kernel;
    weights are bf16, biases f32.  Every matmul accumulates in f32 on the
    MXU; activations are re-cast to bf16 between layers; output is bf16.
    """
    x = x_ref[...].astype(jnp.bfloat16)
    h1 = jnp.dot(x, w1_ref[...], preferred_element_type=jnp.float32) + b1_ref[...]
    h1 = jnp.maximum(h1, 0.0).astype(jnp.bfloat16)
    h2 = jnp.dot(h1, w2_ref[...], preferred_element_type=jnp.float32) + b2_ref[...]
    h2 = jnp.maximum(h2, 0.0).astype(jnp.bfloat16)
    h3 = jnp.dot(h2, w3_ref[...], preferred_element_type=jnp.float32) + b3_ref[...]
    o_ref[...] = h3.astype(o_ref.dtype)


@functools.partial(jax.jit, static_argnames=("block_b",))
def simple_dqn_forward(x, w1, b1, w2, b2, w3, b3, *, block_b=1024):
    """Runs the fused DQN MLP. x: (B, in) f32; wN: (in, out); returns (B, out) f32."""
    B, in_size = x.shape
    hid = w1.shape[1]
    out_size = w3.shape[1]
    compute_dtype = jnp.bfloat16

    # Hidden / output lane padding to 128 (lane-dense intermediates & store).
    hid_p = _round_up(hid, LANE)
    out_p = _round_up(out_size, LANE)

    # Batch tile: multiple of 16 (bf16 sublane packing), capped at block_b,
    # and chosen so the grid has >= 2 steps (both TensorCores busy on v7x).
    tb = min(block_b, _round_up(max(pl.cdiv(B, 2), 1), BF16_SUBLANE))
    tb = max(tb, BF16_SUBLANE)
    b_p = max(_round_up(B, tb), 2 * tb)

    # Single-pass padding with jnp.pad; x keeps its native f32 / unpadded
    # feature dim, weights are cast to bf16 once (VMEM-resident afterwards).
    xp = jnp.pad(x, ((0, b_p - B), (0, 0)))
    w1p = jnp.pad(w1.astype(compute_dtype), ((0, 0), (0, hid_p - hid)))
    w2p = jnp.pad(w2.astype(compute_dtype), ((0, hid_p - hid), (0, hid_p - hid)))
    w3p = jnp.pad(w3.astype(compute_dtype), ((0, hid_p - hid), (0, out_p - out_size)))
    b1p = jnp.pad(b1.reshape(1, -1).astype(jnp.float32), ((0, 0), (0, hid_p - hid)))
    b2p = jnp.pad(b2.reshape(1, -1).astype(jnp.float32), ((0, 0), (0, hid_p - hid)))
    b3p = jnp.pad(b3.reshape(1, -1).astype(jnp.float32), ((0, 0), (0, out_p - out_size)))

    grid = (b_p // tb,)

    # Real (unpadded) cost, per review.
    flops = 2 * B * (in_size * hid + hid * hid + hid * out_size)
    bytes_accessed = (
        B * in_size * 4                                       # x read (f32)
        + (in_size * hid + hid * hid + hid * out_size) * 2    # weights (bf16)
        + (2 * hid + out_size) * 4                            # biases (f32)
        + B * out_size * 2                                    # output (bf16)
    )

    out_padded = pl.pallas_call(
        dqn_kernel,
        out_shape=jax.ShapeDtypeStruct((b_p, out_p), jnp.bfloat16),
        grid=grid,
        in_specs=[
            pl.BlockSpec((tb, in_size), lambda i: (i, 0)),    # x: tiled over batch, unpadded lanes
            pl.BlockSpec((in_size, hid_p), lambda i: (0, 0)),  # w1: VMEM-resident
            pl.BlockSpec((1, hid_p), lambda i: (0, 0)),        # b1
            pl.BlockSpec((hid_p, hid_p), lambda i: (0, 0)),    # w2
            pl.BlockSpec((1, hid_p), lambda i: (0, 0)),        # b2
            pl.BlockSpec((hid_p, out_p), lambda i: (0, 0)),    # w3
            pl.BlockSpec((1, out_p), lambda i: (0, 0)),        # b3
        ],
        out_specs=pl.BlockSpec((tb, out_p), lambda i: (i, 0)),
        compiler_params=pltpu.CompilerParams(
            dimension_semantics=("parallel",),                 # shards batch across v7x's 2 TCs
            vmem_limit_bytes=32 * 1024 * 1024,                 # headroom for larger tb sweeps (v5e)
        ),
        cost_estimate=pl.CostEstimate(
            flops=int(flops), bytes_accessed=int(bytes_accessed), transcendentals=0
        ),
    )(xp, w1p, b1p, w2p, b2p, w3p, b3p)

    return out_padded[:B, :out_size].astype(jnp.float32)


def xavier_uniform(key, fan_in, fan_out, dtype=jnp.float32):
    # Matches torch.nn.init.xavier_uniform_ bound; stored transposed as (in, out).
    bound = (6.0 / (fan_in + fan_out)) ** 0.5
    return jax.random.uniform(key, (fan_in, fan_out), dtype=dtype,
                              minval=-bound, maxval=bound)


def init_params(key, input_size, hidden_size, output_size):
    k1, k2, k3 = jax.random.split(key, 3)
    w1 = xavier_uniform(k1, input_size, hidden_size)
    b1 = jnp.zeros((1, hidden_size), jnp.float32)
    w2 = xavier_uniform(k2, hidden_size, hidden_size)
    b2 = jnp.zeros((1, hidden_size), jnp.float32)
    w3 = xavier_uniform(k3, hidden_size, output_size)
    b3 = jnp.zeros((1, output_size), jnp.float32)
    return w1, b1, w2, b2, w3, b3


def reference_forward_bf16(x, w1, b1, w2, b2, w3, b3):
    """Pure-JAX reference mirroring the kernel's bf16-in / f32-accumulate math."""
    dt = jnp.bfloat16
    xd = x.astype(dt)
    h1 = jnp.dot(xd, w1.astype(dt), preferred_element_type=jnp.float32) + b1
    h1 = jnp.maximum(h1, 0.0).astype(dt)
    h2 = jnp.dot(h1, w2.astype(dt), preferred_element_type=jnp.float32) + b2
    h2 = jnp.maximum(h2, 0.0).astype(dt)
    h3 = jnp.dot(h2, w3.astype(dt), preferred_element_type=jnp.float32) + b3
    return h3.astype(dt).astype(jnp.float32)   # mirror the kernel's bf16 output store


def reference_forward_f32(x, w1, b1, w2, b2, w3, b3):
    h1 = jnp.maximum(x @ w1 + b1, 0.0)
    h2 = jnp.maximum(h1 @ w2 + b2, 0.0)
    return h2 @ w3 + b3


if __name__ == "__main__":
    input_size, hidden_size, output_size = 16, 32, 4
    batch = 8

    key = jax.random.PRNGKey(0)
    k_x, k_p = jax.random.split(key)
    x = jax.random.normal(k_x, (batch, input_size), dtype=jnp.float32)
    params = init_params(k_p, input_size, hidden_size, output_size)

    out = simple_dqn_forward(x, *params)
    out = jax.block_until_ready(out)

    ref_bf16 = reference_forward_bf16(x, *params)   # same quantization as kernel
    ref_f32 = reference_forward_f32(x, *params)     # full-precision sanity check

    assert out.shape == (batch, output_size)
    assert jnp.allclose(out, ref_bf16, atol=1e-2, rtol=1e-2), \
        float(jnp.max(jnp.abs(out - ref_bf16)))
    assert jnp.allclose(out, ref_f32, atol=5e-2, rtol=5e-2), \
        float(jnp.max(jnp.abs(out - ref_f32)))

    print("KERNEL_OK")
</pallas_src>

<mosaic_0001>
module attributes {stable_mosaic.version = 11 : i64} {
  func.func @dqn_kernel(%arg0: i32, %arg1: memref<16x16xf32, #tpu.memory_space<vmem>>, %arg2: memref<16x128xbf16, #tpu.memory_space<vmem>>, %arg3: memref<1x128xf32, #tpu.memory_space<vmem>>, %arg4: memref<128x128xbf16, #tpu.memory_space<vmem>>, %arg5: memref<1x128xf32, #tpu.memory_space<vmem>>, %arg6: memref<128x128xbf16, #tpu.memory_space<vmem>>, %arg7: memref<1x128xf32, #tpu.memory_space<vmem>>, %arg8: memref<16x128xbf16, #tpu.memory_space<vmem>>) attributes {dimension_semantics = [#tpu.dimension_semantics<parallel>], iteration_bounds = array<i64: 2>, scalar_prefetch = 0 : i64, scratch_operands = 0 : i64, tpu.core_type = #tpu.core_type<tc>, window_params = [{transform_indices = @transform_0, window_bounds = array<i64: 16, 16>}, {pipeline_mode = #tpu.pipeline_mode<synchronous>, transform_indices = @transform_1, window_bounds = array<i64: 16, 128>}, {pipeline_mode = #tpu.pipeline_mode<synchronous>, transform_indices = @transform_2, window_bounds = array<i64: 1, 128>}, {pipeline_mode = #tpu.pipeline_mode<synchronous>, transform_indices = @transform_3, window_bounds = array<i64: 128, 128>}, {pipeline_mode = #tpu.pipeline_mode<synchronous>, transform_indices = @transform_4, window_bounds = array<i64: 1, 128>}, {pipeline_mode = #tpu.pipeline_mode<synchronous>, transform_indices = @transform_5, window_bounds = array<i64: 128, 128>}, {pipeline_mode = #tpu.pipeline_mode<synchronous>, transform_indices = @transform_6, window_bounds = array<i64: 1, 128>}, {transform_indices = @transform_7, window_bounds = array<i64: 16, 128>}]} {
    %c0 = arith.constant 0 : index
    %c0_0 = arith.constant 0 : index
    %0 = vector.load %arg1[%c0, %c0_0] : memref<16x16xf32, #tpu.memory_space<vmem>>, vector<16x16xf32>
    %1 = arith.truncf %0 : vector<16x16xf32> to vector<16x16xbf16>
    %c0_1 = arith.constant 0 : index
    %c0_2 = arith.constant 0 : index
    %2 = vector.load %arg2[%c0_1, %c0_2] : memref<16x128xbf16, #tpu.memory_space<vmem>>, vector<16x128xbf16>
    %cst = arith.constant dense<0.000000e+00> : vector<16x128xf32>
    %3 = tpu.matmul %1, %2, %cst {dimension_numbers = #tpu.dot_dimension_numbers<[1], [0], [0], [1], [0, 0, 1, 1], [], []>} : vector<16x16xbf16>, vector<16x128xbf16>, vector<16x128xf32> -> vector<16x128xf32>
    %c0_3 = arith.constant 0 : index
    %c0_4 = arith.constant 0 : index
    %4 = vector.load %arg3[%c0_3, %c0_4] : memref<1x128xf32, #tpu.memory_space<vmem>>, vector<1x128xf32>
    %5 = vector.broadcast %4 : vector<1x128xf32> to vector<16x128xf32>
    %6 = arith.addf %3, %5 : vector<16x128xf32>
    %cst_5 = arith.constant 0.000000e+00 : f32
    %7 = vector.broadcast %cst_5 : f32 to vector<16x128xf32>
    %8 = arith.maximumf %6, %7 : vector<16x128xf32>
    %9 = arith.truncf %8 : vector<16x128xf32> to vector<16x128xbf16>
    %c0_6 = arith.constant 0 : index
    %c0_7 = arith.constant 0 : index
    %10 = vector.load %arg4[%c0_6, %c0_7] : memref<128x128xbf16, #tpu.memory_space<vmem>>, vector<128x128xbf16>
    %cst_8 = arith.constant dense<0.000000e+00> : vector<16x128xf32>
    %11 = tpu.matmul %9, %10, %cst_8 {dimension_numbers = #tpu.dot_dimension_numbers<[1], [0], [0], [1], [0, 0, 1, 1], [], []>} : vector<16x128xbf16>, vector<128x128xbf16>, vector<16x128xf32> -> vector<16x128xf32>
    %c0_9 = arith.constant 0 : index
    %c0_10 = arith.constant 0 : index
    %12 = vector.load %arg5[%c0_9, %c0_10] : memref<1x128xf32, #tpu.memory_space<vmem>>, vector<1x128xf32>
    %13 = vector.broadcast %12 : vector<1x128xf32> to vector<16x128xf32>
    %14 = arith.addf %11, %13 : vector<16x128xf32>
    %cst_11 = arith.constant 0.000000e+00 : f32
    %15 = vector.broadcast %cst_11 : f32 to vector<16x128xf32>
    %16 = arith.maximumf %14, %15 : vector<16x128xf32>
    %17 = arith.truncf %16 : vector<16x128xf32> to vector<16x128xbf16>
    %c0_12 = arith.constant 0 : index
    %c0_13 = arith.constant 0 : index
    %18 = vector.load %arg6[%c0_12, %c0_13] : memref<128x128xbf16, #tpu.memory_space<vmem>>, vector<128x128xbf16>
    %cst_14 = arith.constant dense<0.000000e+00> : vector<16x128xf32>
    %19 = tpu.matmul %17, %18, %cst_14 {dimension_numbers = #tpu.dot_dimension_numbers<[1], [0], [0], [1], [0, 0, 1, 1], [], []>} : vector<16x128xbf16>, vector<128x128xbf16>, vector<16x128xf32> -> vector<16x128xf32>
    %c0_15 = arith.constant 0 : index
    %c0_16 = arith.constant 0 : index
    %20 = vector.load %arg7[%c0_15, %c0_16] : memref<1x128xf32, #tpu.memory_space<vmem>>, vector<1x128xf32>
    %21 = vector.broadcast %20 : vector<1x128xf32> to vector<16x128xf32>
    %22 = arith.addf %19, %21 : vector<16x128xf32>
    %23 = arith.truncf %22 : vector<16x128xf32> to vector<16x128xbf16>
    %c0_17 = arith.constant 0 : index
    %c0_18 = arith.constant 0 : index
    %24 = vector.load %arg8[%c0_17, %c0_18] : memref<16x128xbf16, #tpu.memory_space<vmem>>, vector<16x128xbf16>
    tpu.vector_store %arg8[%c0_17, %c0_18], %23 {strides = array<i32>} : memref<16x128xbf16, #tpu.memory_space<vmem>>, vector<16x128xbf16>,
    return
  }
  func.func @transform_0(%arg0: i32) -> (i32, i32) {
    %c0_i32 = arith.constant 0 : i32
    %c0_i32_0 = arith.constant 0 : i32
    return %arg0, %c0_i32 : i32, i32
  }
  func.func @transform_1(%arg0: i32) -> (i32, i32) {
    %c0_i32 = arith.constant 0 : i32
    %c0_i32_0 = arith.constant 0 : i32
    %c0_i32_1 = arith.constant 0 : i32
    return %c0_i32, %c0_i32_0 : i32, i32
  }
  func.func @transform_2(%arg0: i32) -> (i32, i32) {
    %c0_i32 = arith.constant 0 : i32
    %c0_i32_0 = arith.constant 0 : i32
    %c0_i32_1 = arith.constant 0 : i32
    return %c0_i32, %c0_i32_0 : i32, i32
  }
  func.func @transform_3(%arg0: i32) -> (i32, i32) {
    %c0_i32 = arith.constant 0 : i32
    %c0_i32_0 = arith.constant 0 : i32
    %c0_i32_1 = arith.constant 0 : i32
    return %c0_i32, %c0_i32_0 : i32, i32
  }
  func.func @transform_4(%arg0: i32) -> (i32, i32) {
    %c0_i32 = arith.constant 0 : i32
    %c0_i32_0 = arith.constant 0 : i32
    %c0_i32_1 = arith.constant 0 : i32
    return %c0_i32, %c0_i32_0 : i32, i32
  }
  func.func @transform_5(%arg0: i32) -> (i32, i32) {
    %c0_i32 = arith.constant 0 : i32
    %c0_i32_0 = arith.constant 0 : i32
    %c0_i32_1 = arith.constant 0 : i32
    return %c0_i32, %c0_i32_0 : i32, i32
  }
  func.func @transform_6(%arg0: i32) -> (i32, i32) {
    %c0_i32 = arith.constant 0 : i32
    %c0_i32_0 = arith.constant 0 : i32
    %c0_i32_1 = arith.constant 0 : i32
    return %c0_i32, %c0_i32_0 : i32, i32
  }
  func.func @transform_7(%arg0: i32) -> (i32, i32) {
    %c0_i32 = arith.constant 0 : i32
    %c0_i32_0 = arith.constant 0 : i32
    return %arg0, %c0_i32 : i32, i32
  }
}

</mosaic_0001>

<bundles_post_ra>
// kernel: simple_dqn_forward.1
= control target key start
LH: loop header
LB: loop body
LE: loop exit
PB: predicated region body
PF: predicated region fallthrough
CT: control target
= control target key end

     0   :  { %s826_s24 = smov 0   ;;  %s930_s0 = inlined_call_operand.vmem [shape: f32[32,16], index: 0, kind: input, shape index: {}]   ;;  %s931_s1 = inlined_call_operand.vmem [shape: bf16[16,128], index: 1, kind: input, shape index: {}]   ;;  %s932_s2 = inlined_call_operand.vmem [shape: f32[1,128], index: 2, kind: input, shape index: {}]   ;;  %s933_s3 = inlined_call_operand.vmem [shape: bf16[128,128], index: 3, kind: input, shape index: {}]   ;;  %s934_s4 = inlined_call_operand.vmem [shape: f32[1,128], index: 4, kind: input, shape index: {}]   ;;  %s935_s5 = inlined_call_operand.vmem [shape: bf16[128,128], index: 5, kind: input, shape index: {}]   ;;  %s936_s6 = inlined_call_operand.vmem [shape: f32[1,128], index: 6, kind: input, shape index: {}]   ;;  %s937_s7 = inlined_call_operand.vmem [shape: bf16[32,128], index: 7, kind: output, shape index: {}]  }
   0x1 LB: > { %s642_s25 = sadd.s32 4294967295, %s782_s24   ;;  %p646_p0 = scmp.ge.s32.totalorder %s782_s24, 1  ;;  %s782_s24 = sphi %s826_s24, %s17_s24  }
   0x2   : > { %p238_p1 = scmp.lt.s32.totalorder %s782_s24, 3 }
   0x4   : > { %p239_p2 = pnand %p646_p0, %p238_p1 }
   0x5   : > { %v759_v0 = vld [vmem:[%s931_s1] sm:$0xff] (!%p239_p2)   ;;  %v784_v1 = vmov (!%p239_p2), 0.0   ;;  %s647_s28 = sshll.u32 (!%p239_p2), %s642_s25, 1  ;;  %vm785_vm0 = vmmov (!%p239_p2), 0   ;;  %v761_v3 = vld [vmem:[%s933_s3 + $0x8] sm:$0xff] (!%p239_p2)   ;;  %v762_v4 = vld [vmem:[%s933_s3 + $0x10] sm:$0xff] (!%p239_p2)  }
   0x6   : > { %242 = sbr.rel (%p239_p2) target bundleno = 678 (0x2a6), region = 48  ;;  %703 = vmatprep.subr.bf16.mxu0 (!%p239_p2), %v784_v1  ;;  %709 = vmatprep.subr.bf16.mxu1 (!%p239_p2), %v784_v1  ;;  %v760_v2 = vld [vmem:[%s933_s3] sm:$0xff] (!%p239_p2)   ;;  %p271_p3 = scmp.lt.s32.totalorder (!%p239_p2), %s647_s28, 3  ;;  %vm301_vm1 = vcmask (!%p239_p2), 130048   ;;  %v763_v8 = vld [vmem:[%s933_s3 + $0x18] sm:$0xff] (!%p239_p2)   ;;  %v765_v10 = vld [vmem:[%s933_s3 + $0x28] sm:$0xff] (!%p239_p2)  }
   0x7   : > { %704 = vmatpush3.bf16.msra.mxu0 (!%p239_p2), %v759_v0  ;;  %705 = vmatprep.mubr.msk.bf16.mxu0 (!%p239_p2), %vm785_vm0, %v784_v1  ;;  %v764_v9 = vld [vmem:[%s933_s3 + $0x20] sm:$0xff] (!%p239_p2)   ;;  %v766_v11 = vld [vmem:[%s933_s3 + $0x30] sm:$0xff] (!%p239_p2)   ;;  %v767_v12 = vld [vmem:[%s933_s3 + $0x38] sm:$0xff] (!%p239_p2)  }
   0x8   : > { %710 = vmatpush3.bf16.msra.mxu1 (!%p239_p2), %v760_v2  ;;  %725 = vmatprep.mubr.msk.bf16.mxu1 (!%p239_p2), %vm785_vm0, %v784_v1  ;;  %v768_v13 = vld [vmem:[%s935_s5] sm:$0xff] (!%p239_p2)   ;;  %v769_v14 = vld [vmem:[%s935_s5 + $0x8] sm:$0xff] (!%p239_p2)   ;;  %v770_v15 = vld [vmem:[%s935_s5 + $0x10] sm:$0xff] (!%p239_p2)  }
   0x9   : > { %711 = vmatprep.subr.bf16.mxu1 (!%p239_p2), %v784_v1  ;;  %729 = vmatprep.subr.bf16.mxu0 (!%p239_p2), %v784_v1  ;;  %v771_v16 = vld [vmem:[%s935_s5 + $0x18] sm:$0xff] (!%p239_p2)   ;;  %v772_v17 = vld [vmem:[%s935_s5 + $0x20] sm:$0xff] (!%p239_p2)   ;;  %v773_v18 = vld [vmem:[%s935_s5 + $0x28] sm:$0xff] (!%p239_p2)  }
   0xa   : > { %v651_v19 = vld [vmem:[%s932_s2] ss:$0 sm:$0xff] (!%p239_p2)  ;;  %v774_v29 = vld [vmem:[%s935_s5 + $0x30] sm:$0xff] (!%p239_p2)   ;;  %v775_v30 = vld [vmem:[%s935_s5 + $0x38] sm:$0xff] (!%p239_p2)  }
   0xb   : > { %v654_v31 = vld [vmem:[%s934_s4] ss:$0 sm:$0xff] (!%p239_p2) }
   0xc   : > { %712 = vmatpush3.bf16.msra.mxu1 (!%p239_p2), %v761_v3  ;;  %v663_v41 = vld [vmem:[%s936_s6] ss:$0 sm:$0xff] (!%p239_p2) }
   0xd   : > { %s939_s28 = smov (!%p271_p3, %s647_s28), 3  ;;  %713 = vmatprep.subr.bf16.mxu1 %v784_v1 }
   0xe   : > { %s648_s10 = sshll.u32 %s939_s28, 3  ;;  %s650_s29 = sshll.u32 %s939_s28, 2 }
   0xf   : > { %s274_s13 = scalar_lea.vmem %s930_s0, %s648_s10  ;;  %s280_s9 = scalar_lea.vmem %s937_s7, %s650_s29 }
  0x10   : > { %v283_v5 = vld [vmem:[%s274_s13] sm:$0xff]  ;;  %v284_v6 = vld [vmem:[%s274_s13 + $0x8] sm:$0xff]  ;;  %714 = vmatpush3.bf16.msra.mxu1 %v762_v4 }
  0x11   : > { %v285_v7 = vpack.c.bf16 %v284_v6, %v283_v5  ;;  %715 = vmatprep.subr.bf16.mxu1 %v784_v1 }
  0x13   : > { %706 = vmatmul.mubr.msk.bf16.vlgmr.msra.gmra.mrb[0].mxu0 %vm301_vm1, %v285_v7 }
  0x14   : > { %745 = vmatprep.mubr.msk.bf16.mxu0 %vm785_vm0, %v784_v1  ;;  %716 = vmatpush3.bf16.msra.mxu1 %v763_v8 }
  0x15   : > { %717 = vmatprep.subr.bf16.mxu1 %v784_v1  ;;  %730 = vmatpush3.bf16.msra.mxu0 %v768_v13 }
  0x16   : > { %731 = vmatprep.subr.bf16.mxu0 %v784_v1 }
  0x18   : > { %718 = vmatpush3.bf16.msra.mxu1 %v764_v9 }
  0x19   : > { %719 = vmatprep.subr.bf16.mxu1 %v784_v1  ;;  %732 = vmatpush3.bf16.msra.mxu0 %v769_v14 }
  0x1a   : > { %733 = vmatprep.subr.bf16.mxu0 %v784_v1 }
  0x1c   : > { %720 = vmatpush3.bf16.msra.mxu1 %v765_v10 }
  0x1d   : > { %721 = vmatprep.subr.bf16.mxu1 %v784_v1  ;;  %734 = vmatpush3.bf16.msra.mxu0 %v770_v15 }
  0x1e   : > { %735 = vmatprep.subr.bf16.mxu0 %v784_v1 }
  0x20   : > { %722 = vmatpush3.bf16.msra.mxu1 %v766_v11 }
  0x21   : > { %723 = vmatprep.subr.bf16.mxu1 %v784_v1  ;;  %736 = vmatpush3.bf16.msra.mxu0 %v771_v16 }
  0x22   : > { %737 = vmatprep.subr.bf16.mxu0 %v784_v1 }
  0x24   : > { %724 = vmatpush3.bf16.msra.mxu1 %v767_v12 }
  0x25   : > { %738 = vmatpush3.bf16.msra.mxu0 %v772_v17 }
  0x26   : > { %739 = vmatprep.subr.bf16.mxu0 %v784_v1 }
  0x29   : > { %740 = vmatpush3.bf16.msra.mxu0 %v773_v18 }
  0x2a   : > { %741 = vmatprep.subr.bf16.mxu0 %v784_v1 }
  0x2d   : > { %742 = vmatpush3.bf16.msra.mxu0 %v774_v29 }
  0x2e   : > { %743 = vmatprep.subr.bf16.mxu0 %v784_v1 }
  0x31   : > { %744 = vmatpush3.bf16.msra.mxu0 %v775_v30 }
  0xe6   : > { %v339_v20 = vpop.f32.mrb[0].mxu0 }
  0xe7   : > { %v340_v21 = vadd.f32 %v651_v19, %v339_v20  ;;  %v707_v22 = vpop.f32.mrb[1].mxu0 }
  0xe8   : > { %v342_v23 = vpop.f32.mrb[2].mxu0 }
  0xe9   : > { %v343_v24 = vadd.f32 %v651_v19, %v342_v23  ;;  %v708_v25 = vpop.f32.mrb[3].mxu0  ;;  %v346_v26 = vmax.f32 %v340_v21, 0.0 }
  0xeb   : > { %v347_v27 = vmax.f32 %v343_v24, 0.0 }
  0xed   : > { %v348_v28 = vpack.c.bf16 %v347_v27, %v346_v26 }
  0xef   : > { %726 = vmatmul.mubr.bf16.vlgmr.msra.gmra.mrb[0].mxu1 %v348_v28 }
 0x1c2   : > { %v454_v32 = vpop.f32.mrb[0].mxu1 }
 0x1c3   : > { %v455_v33 = vadd.f32 %v654_v31, %v454_v32  ;;  %v727_v34 = vpop.f32.mrb[1].mxu1 }
 0x1c4   : > { %v457_v35 = vpop.f32.mrb[2].mxu1 }
 0x1c5   : > { %v458_v36 = vadd.f32 %v654_v31, %v457_v35  ;;  %v728_v37 = vpop.f32.mrb[3].mxu1  ;;  %v461_v38 = vmax.f32 %v455_v33, 0.0 }
 0x1c7   : > { %v462_v39 = vmax.f32 %v458_v36, 0.0 }
 0x1c9   : > { %v463_v40 = vpack.c.bf16 %v462_v39, %v461_v38 }
 0x1cb   : > { %746 = vmatmul.mubr.bf16.vlgmr.msra.gmra.mrb[4].mxu0 %v463_v40 }
 0x29e   : > { %v569_v42 = vpop.f32.mrb[4].mxu0 }
 0x29f   : > { %v747_v43 = vpop.f32.mrb[5].mxu0  ;;  %v570_v45 = vadd.f32 %v663_v41, %v569_v42 }
 0x2a0   : > { %v572_v44 = vpop.f32.mrb[6].mxu0 }
 0x2a1   : > { %v573_v46 = vadd.f32 %v663_v41, %v572_v44  ;;  %v748_v47 = vpop.f32.mrb[7].mxu0 }
 0x2a3   : > { %v681_v48 = vpack.c.bf16 %v573_v46, %v570_v45 }
 0x2a5   : > { %682 = vst [vmem:[%s280_s9] sm:$0xff] %v681_v48  }
 0x2a6 PF: > { %s17_s24 = sadd.s32 1, %s782_s24  }
 0x2a7   : > { %p14_p4 = scmp.ge.s32.totalorder %s17_s24, 4  }
 0x2a9   :  { %16 = sbr.rel (!%p14_p4) target bundleno = 1 (0x1), region = 78 }

</bundles_post_ra>
